<compile_context>
chip_gen: v6e
topology: v6e:2x2x1
jax: 0.10.0
libtpu: 0.0.40
codegen_flags: <defaults>
</compile_context>

<pallas_src>
import functools
import math

import jax
import jax.numpy as jnp
from jax.experimental import pallas as pl
from jax.experimental.pallas import tpu as pltpu


def _conv_stats_kernel(x_ref, w_ref, b_ref, y_ref, stats_ref, rhs_ref,
                       *, K, pad, L_out, mxu_dtype):
    """Conv1d (im2col, single MXU matmul) + partial BN stats for one batch element.

    x_ref     : (1, Cin, L)       input tile, channel-major (NCL)
    w_ref     : (Cout, K*Cin)     conv weights, (k, c_in) flattened k-major
    b_ref     : (Cout, 1)         conv bias (f32)
    y_ref     : (1, Cout, L_out)  pre-BN conv activations (f32), length on lanes
    stats_ref : (1, Cout, 2)      per-grid-step partial [sum, sum_of_squares]
    rhs_ref   : (K*Cin, L_out)    f32 VMEM scratch holding the im2col RHS
    """
    Cin = x_ref.shape[1]
    L = x_ref.shape[2]

    x = x_ref[0].astype(jnp.float32)                       # (Cin, L)

    # Assemble the im2col RHS with plain sub-block stores: K statically shifted copies
    # of the input; the conv "same" zero padding is written here in-kernel.
    for k in range(K):
        off = k - pad                                      # source column = out column + off
        lo = max(0, -off)                                  # leading zero columns
        src_lo, src_hi = max(0, off), min(L, L_out + off)
        n_src = max(0, src_hi - src_lo)
        hi = L_out - lo - n_src                            # trailing zero columns
        r0, r1 = k * Cin, (k + 1) * Cin
        if lo:
            rhs_ref[r0:r1, 0:lo] = jnp.zeros((Cin, lo), jnp.float32)
        if n_src:
            rhs_ref[r0:r1, lo:lo + n_src] = x[:, src_lo:src_hi]
        if hi:
            rhs_ref[r0:r1, lo + n_src:] = jnp.zeros((Cin, hi), jnp.float32)

    # One MXU matmul with a K*Cin contraction: bf16 operands, f32 accumulation.
    y = jnp.dot(w_ref[...].astype(mxu_dtype),
                rhs_ref[...].astype(mxu_dtype),
                preferred_element_type=jnp.float32)        # (Cout, L_out)
    y = y + b_ref[...]                                     # bias broadcast along lanes
    y_ref[0] = y.astype(y_ref.dtype)

    # Partial BatchNorm statistics fused into the conv pass (no re-read of y).
    stats_ref[0, :, 0:1] = jnp.sum(y, axis=-1, keepdims=True)
    stats_ref[0, :, 1:2] = jnp.sum(y * y, axis=-1, keepdims=True)


def _bn_pool_gelu_kernel(y_ref, scale_ref, shift_ref, o_ref, yt_ref, *, P, L_pool):
    """Folded BN affine + MaxPool1d(P) + exact-erf GELU for one batch element.

    y_ref     : (1, Cout, L_out)   pre-BN conv activations
    scale_ref : (Cout, 1)          gamma * rsqrt(var + eps)
    shift_ref : (Cout, 1)          beta - mean * scale
    o_ref     : (1, Cout, L_pool)  final output, NCL (length on lanes)
    yt_ref    : (L_pool*P, Cout)   f32 VMEM scratch (length-major view for strided pooling)
    """
    inv_sqrt2 = 0.7071067811865476
    Lv = L_pool * P

    y = y_ref[0]                                           # single contiguous read of the tile
    if Lv != y.shape[-1]:
        y = y[:, :Lv]                                      # MaxPool1d truncation (static slice)
    yn = y.astype(jnp.float32) * scale_ref[...] + shift_ref[...]   # BN affine applied once

    # Dropout(p=0.0) is the identity in this configuration.
    # TODO(synk): training-mode dropout with p > 0 (pltpu.prng_* mask) not implemented.

    if P == 1:
        pooled = yn
    else:
        # Pool along length with sublane-strided reads: one XLU transpose into a VMEM
        # scratch, then P strided row-slices max-reduced (VMEM-local, no HBM traffic).
        yt_ref[...] = yn.T                                 # (Lv, Cout)
        pooled_t = yt_ref[pl.ds(0, L_pool, stride=P), :]
        for p in range(1, P):
            pooled_t = jnp.maximum(pooled_t, yt_ref[pl.ds(p, L_pool, stride=P), :])
        pooled = pooled_t.T                                # (Cout, L_pool), length back on lanes

    gel = 0.5 * pooled * (1.0 + jax.lax.erf(pooled * inv_sqrt2))
    o_ref[0] = gel.astype(o_ref.dtype)


def _vmem_limit_bytes(*nbytes):
    # Double-buffered pipeline blocks + headroom for in-kernel temporaries, clamped so the
    # request stays comfortably under v7x's 64 MiB physical VMEM (128 MiB on v5e/v6e).
    est = 4 * int(sum(nbytes)) + (8 << 20)
    return int(min(max(est, 16 << 20), 48 << 20))


@functools.partial(jax.jit, static_argnames=("pool_size", "eps", "mxu_dtype"))
def conv_layer_forward(x, w, b, gamma, beta, *, pool_size, eps=1e-5,
                       mxu_dtype=jnp.bfloat16):
    """x: (N, Cin, L) NCL; w: (Cout, Cin, K); b/gamma/beta: (Cout,). Returns (N, Cout, L_pool)."""
    N, Cin, L = x.shape
    Cout, _, K = w.shape
    pad = K // 2
    L_out = L + 2 * pad - K + 1
    P = pool_size if pool_size is not None else 1
    L_pool = L_out // P

    # Tiny parameter prep only (no data-sized pads or layout transposes in HBM).
    w2 = jnp.transpose(w, (0, 2, 1)).reshape(Cout, K * Cin)         # (Cout, K*Cin), k-major
    b2 = b.astype(jnp.float32).reshape(Cout, 1)

    # ---- pass 1: conv + partial BN statistics (batch grid, megacore-parallel) ----
    # TODO(synk): for very long L, add a halo'd length-tile grid axis to bound VMEM further.
    kernel_a = functools.partial(_conv_stats_kernel, K=K, pad=pad, L_out=L_out,
                                 mxu_dtype=mxu_dtype)
    vmem_a = _vmem_limit_bytes(Cin * L * x.dtype.itemsize, Cout * K * Cin * 4, Cout * 4,
                               Cout * L_out * 4, Cout * 2 * 4, K * Cin * L_out * 4)
    y, stats = pl.pallas_call(
        kernel_a,
        out_shape=(jax.ShapeDtypeStruct((N, Cout, L_out), jnp.float32),
                   jax.ShapeDtypeStruct((N, Cout, 2), jnp.float32)),
        grid=(N,),
        in_specs=[
            pl.BlockSpec((1, Cin, L), lambda n: (n, 0, 0)),
            pl.BlockSpec((Cout, K * Cin), lambda n: (0, 0)),
            pl.BlockSpec((Cout, 1), lambda n: (0, 0)),
        ],
        out_specs=(
            pl.BlockSpec((1, Cout, L_out), lambda n: (n, 0, 0)),
            pl.BlockSpec((1, Cout, 2), lambda n: (n, 0, 0)),
        ),
        scratch_shapes=[pltpu.VMEM((K * Cin, L_out), jnp.float32)],
        compiler_params=pltpu.CompilerParams(
            dimension_semantics=("parallel",), vmem_limit_bytes=vmem_a),
    )(x, w2, b2)

    # ---- BatchNorm1d batch statistics (training mode, biased variance); tiny reduce ----
    tot = jnp.sum(stats, axis=0)                                    # (Cout, 2), f32 partials
    cnt = jnp.float32(N * L_out)
    mean = tot[:, 0] / cnt
    var = jnp.maximum(tot[:, 1] / cnt - mean * mean, 0.0)           # f32 accumulation upstream
    scale = gamma.astype(jnp.float32) * jax.lax.rsqrt(var + eps)
    shift = beta.astype(jnp.float32) - mean * scale

    # ---- pass 2: folded BN + MaxPool1d + GELU (single read of y, NCL output) ----
    kernel_b = functools.partial(_bn_pool_gelu_kernel, P=P, L_pool=L_pool)
    vmem_b = _vmem_limit_bytes(Cout * L_out * 4, 2 * Cout * 4,
                               Cout * L_pool * x.dtype.itemsize, L_pool * P * Cout * 4)
    out = pl.pallas_call(
        kernel_b,
        out_shape=jax.ShapeDtypeStruct((N, Cout, L_pool), x.dtype),
        grid=(N,),
        in_specs=[
            pl.BlockSpec((1, Cout, L_out), lambda n: (n, 0, 0)),
            pl.BlockSpec((Cout, 1), lambda n: (0, 0)),
            pl.BlockSpec((Cout, 1), lambda n: (0, 0)),
        ],
        out_specs=pl.BlockSpec((1, Cout, L_pool), lambda n: (n, 0, 0)),
        scratch_shapes=[pltpu.VMEM((L_pool * P, Cout), jnp.float32)],
        compiler_params=pltpu.CompilerParams(
            dimension_semantics=("parallel",), vmem_limit_bytes=vmem_b),
    )(y, scale.reshape(Cout, 1), shift.reshape(Cout, 1))

    return out


def reference(x, w, b, gamma, beta, pool_size, eps=1e-5):
    """Plain-JAX reference mirroring the PyTorch forward (training-mode BN, p=0 dropout)."""
    pad = w.shape[2] // 2
    y = jax.lax.conv_general_dilated(
        x, w, window_strides=(1,), padding=[(pad, pad)],
        dimension_numbers=("NCH", "OIH", "NCH"))
    y = y + b[None, :, None]
    mean = jnp.mean(y, axis=(0, 2), keepdims=True)
    var = jnp.mean((y - mean) ** 2, axis=(0, 2), keepdims=True)
    y = (y - mean) / jnp.sqrt(var + eps)
    y = y * gamma[None, :, None] + beta[None, :, None]
    P = pool_size
    Lp = y.shape[2] // P
    y = y[:, :, :Lp * P].reshape(y.shape[0], y.shape[1], Lp, P).max(axis=-1)
    return 0.5 * y * (1.0 + jax.lax.erf(y / jnp.sqrt(2.0)))


if __name__ == "__main__":
    N, Cin, Cout, L, K, P = 2, 4, 8, 16, 3, 2

    key = jax.random.PRNGKey(0)
    k1, k2, k3, k4, k5 = jax.random.split(key, 5)
    x = jax.random.normal(k1, (N, Cin, L), jnp.float32)

    # deterministic parameter init (shapes from ConvLayer.__init__; Conv1d-style uniform bound)
    bound = 1.0 / math.sqrt(Cin * K)
    w = jax.random.uniform(k2, (Cout, Cin, K), jnp.float32, -bound, bound)
    b = jax.random.uniform(k3, (Cout,), jnp.float32, -bound, bound)
    gamma = 1.0 + 0.1 * jax.random.normal(k4, (Cout,), jnp.float32)
    beta = 0.1 * jax.random.normal(k5, (Cout,), jnp.float32)

    out = conv_layer_forward(x, w, b, gamma, beta, pool_size=P)
    out = jax.block_until_ready(out)

    ref = reference(x, w, b, gamma, beta, P)
    assert out.shape == (N, Cout, L // P), out.shape
    err = float(jnp.max(jnp.abs(out - ref)))
    # bf16 MXU operands (f32 accumulation) vs. an all-f32 reference.
    assert err < 5e-2, f"max abs err {err}"

    print("KERNEL_OK")
</pallas_src>

<mosaic_0001>
module attributes {stable_mosaic.version = 11 : i64} {
  func.func @_conv_stats_kernel(%arg0: i32, %arg1: memref<1x4x16xf32, #tpu.memory_space<vmem>>, %arg2: memref<8x12xf32, #tpu.memory_space<vmem>>, %arg3: memref<8x1xf32, #tpu.memory_space<vmem>>, %arg4: memref<1x8x16xf32, #tpu.memory_space<vmem>>, %arg5: memref<1x8x2xf32, #tpu.memory_space<vmem>>, %arg6: memref<12x16xf32, #tpu.memory_space<vmem>>) attributes {dimension_semantics = [#tpu.dimension_semantics<parallel>], iteration_bounds = array<i64: 2>, scalar_prefetch = 0 : i64, scratch_operands = 1 : i64, tpu.core_type = #tpu.core_type<tc>, window_params = [{transform_indices = @transform_0, window_bounds = array<i64: 1, 4, 16>}, {pipeline_mode = #tpu.pipeline_mode<synchronous>, transform_indices = @transform_1, window_bounds = array<i64: 8, 12>}, {pipeline_mode = #tpu.pipeline_mode<synchronous>, transform_indices = @transform_2, window_bounds = array<i64: 8, 1>}, {transform_indices = @transform_3, window_bounds = array<i64: 1, 8, 16>}, {transform_indices = @transform_4, window_bounds = array<i64: 1, 8, 2>}]} {
    %c0 = arith.constant 0 : index
    %c0_0 = arith.constant 0 : index
    %c0_1 = arith.constant 0 : index
    %0 = vector.load %arg1[%c0, %c0_0, %c0_1] : memref<1x4x16xf32, #tpu.memory_space<vmem>>, vector<1x4x16xf32>
    %1 = vector.shape_cast %0 : vector<1x4x16xf32> to vector<4x16xf32>
    %cst = arith.constant 0.000000e+00 : f32
    %2 = vector.broadcast %cst : f32 to vector<4x1xf32>
    %c0_2 = arith.constant 0 : index
    %c0_3 = arith.constant 0 : index
    %3 = vector.load %arg6[%c0_2, %c0_3] : memref<12x16xf32, #tpu.memory_space<vmem>>, vector<4x1xf32>
    tpu.vector_store %arg6[%c0_2, %c0_3], %2 {strides = array<i32>} : memref<12x16xf32, #tpu.memory_space<vmem>>, vector<4x1xf32>,
    %4 = vector.extract_strided_slice %1 {offsets = [0, 0], sizes = [4, 15], strides = [1, 1]} : vector<4x16xf32> to vector<4x15xf32>
    %c0_4 = arith.constant 0 : index
    %c1 = arith.constant 1 : index
    %5 = vector.load %arg6[%c0_4, %c1] : memref<12x16xf32, #tpu.memory_space<vmem>>, vector<4x15xf32>
    tpu.vector_store %arg6[%c0_4, %c1], %4 {strides = array<i32>} : memref<12x16xf32, #tpu.memory_space<vmem>>, vector<4x15xf32>,
    %c4 = arith.constant 4 : index
    %c0_5 = arith.constant 0 : index
    %6 = vector.load %arg6[%c4, %c0_5] : memref<12x16xf32, #tpu.memory_space<vmem>>, vector<4x16xf32>
    tpu.vector_store %arg6[%c4, %c0_5], %1 {strides = array<i32>} : memref<12x16xf32, #tpu.memory_space<vmem>>, vector<4x16xf32>,
    %7 = vector.extract_strided_slice %1 {offsets = [0, 1], sizes = [4, 15], strides = [1, 1]} : vector<4x16xf32> to vector<4x15xf32>
    %c8 = arith.constant 8 : index
    %c0_6 = arith.constant 0 : index
    %8 = vector.load %arg6[%c8, %c0_6] : memref<12x16xf32, #tpu.memory_space<vmem>>, vector<4x15xf32>
    tpu.vector_store %arg6[%c8, %c0_6], %7 {strides = array<i32>} : memref<12x16xf32, #tpu.memory_space<vmem>>, vector<4x15xf32>,
    %cst_7 = arith.constant 0.000000e+00 : f32
    %9 = vector.broadcast %cst_7 : f32 to vector<4x1xf32>
    %c8_8 = arith.constant 8 : index
    %c15 = arith.constant 15 : index
    %10 = vector.load %arg6[%c8_8, %c15] : memref<12x16xf32, #tpu.memory_space<vmem>>, vector<4x1xf32>
    tpu.vector_store %arg6[%c8_8, %c15], %9 {strides = array<i32>} : memref<12x16xf32, #tpu.memory_space<vmem>>, vector<4x1xf32>,
    %c0_9 = arith.constant 0 : index
    %c0_10 = arith.constant 0 : index
    %11 = vector.load %arg2[%c0_9, %c0_10] : memref<8x12xf32, #tpu.memory_space<vmem>>, vector<8x12xf32>
    %12 = arith.truncf %11 : vector<8x12xf32> to vector<8x12xbf16>
    %c0_11 = arith.constant 0 : index
    %c0_12 = arith.constant 0 : index
    %13 = vector.load %arg6[%c0_11, %c0_12] : memref<12x16xf32, #tpu.memory_space<vmem>>, vector<12x16xf32>
    %14 = arith.truncf %13 : vector<12x16xf32> to vector<12x16xbf16>
    %cst_13 = arith.constant dense<0.000000e+00> : vector<8x16xf32>
    %15 = tpu.matmul %12, %14, %cst_13 {dimension_numbers = #tpu.dot_dimension_numbers<[1], [0], [0], [1], [0, 0, 1, 1], [], []>} : vector<8x12xbf16>, vector<12x16xbf16>, vector<8x16xf32> -> vector<8x16xf32>
    %c0_14 = arith.constant 0 : index
    %c0_15 = arith.constant 0 : index
    %16 = vector.load %arg3[%c0_14, %c0_15] : memref<8x1xf32, #tpu.memory_space<vmem>>, vector<8x1xf32>
    %17 = vector.broadcast %16 : vector<8x1xf32> to vector<8x16xf32>
    %18 = arith.addf %15, %17 : vector<8x16xf32>
    %c0_16 = arith.constant 0 : index
    %c0_17 = arith.constant 0 : index
    %c0_18 = arith.constant 0 : index
    %19 = vector.load %arg4[%c0_16, %c0_17, %c0_18] : memref<1x8x16xf32, #tpu.memory_space<vmem>>, vector<1x8x16xf32>
    %20 = vector.shape_cast %19 : vector<1x8x16xf32> to vector<8x16xf32>
    %21 = vector.shape_cast %18 : vector<8x16xf32> to vector<1x8x16xf32>
    tpu.vector_store %arg4[%c0_16, %c0_17, %c0_18], %21 {strides = array<i32>} : memref<1x8x16xf32, #tpu.memory_space<vmem>>, vector<1x8x16xf32>,
    %cst_19 = arith.constant dense<0.000000e+00> : vector<8xf32>
    %22 = vector.multi_reduction <add>, %18, %cst_19 [1] : vector<8x16xf32> to vector<8xf32>
    %23 = vector.shape_cast %22 : vector<8xf32> to vector<8x1xf32>
    %c0_20 = arith.constant 0 : index
    %c0_21 = arith.constant 0 : index
    %c0_22 = arith.constant 0 : index
    %24 = vector.load %arg5[%c0_20, %c0_21, %c0_22] : memref<1x8x2xf32, #tpu.memory_space<vmem>>, vector<1x8x1xf32>
    %25 = vector.shape_cast %24 : vector<1x8x1xf32> to vector<8x1xf32>
    %26 = vector.shape_cast %23 : vector<8x1xf32> to vector<1x8x1xf32>
    tpu.vector_store %arg5[%c0_20, %c0_21, %c0_22], %26 {strides = array<i32>} : memref<1x8x2xf32, #tpu.memory_space<vmem>>, vector<1x8x1xf32>,
    %27 = arith.mulf %18, %18 : vector<8x16xf32>
    %cst_23 = arith.constant dense<0.000000e+00> : vector<8xf32>
    %28 = vector.multi_reduction <add>, %27, %cst_23 [1] : vector<8x16xf32> to vector<8xf32>
    %29 = vector.shape_cast %28 : vector<8xf32> to vector<8x1xf32>
    %c0_24 = arith.constant 0 : index
    %c0_25 = arith.constant 0 : index
    %c1_26 = arith.constant 1 : index
    %30 = vector.load %arg5[%c0_24, %c0_25, %c1_26] : memref<1x8x2xf32, #tpu.memory_space<vmem>>, vector<1x8x1xf32>
    %31 = vector.shape_cast %30 : vector<1x8x1xf32> to vector<8x1xf32>
    %32 = vector.shape_cast %29 : vector<8x1xf32> to vector<1x8x1xf32>
    tpu.vector_store %arg5[%c0_24, %c0_25, %c1_26], %32 {strides = array<i32>} : memref<1x8x2xf32, #tpu.memory_space<vmem>>, vector<1x8x1xf32>,
    return
  }
  func.func @transform_0(%arg0: i32) -> (i32, i32, i32) {
    %c0_i32 = arith.constant 0 : i32
    %c0_i32_0 = arith.constant 0 : i32
    %c0_i32_1 = arith.constant 0 : i32
    return %arg0, %c0_i32, %c0_i32_0 : i32, i32, i32
  }
  func.func @transform_1(%arg0: i32) -> (i32, i32) {
    %c0_i32 = arith.constant 0 : i32
    %c0_i32_0 = arith.constant 0 : i32
    %c0_i32_1 = arith.constant 0 : i32
    return %c0_i32, %c0_i32_0 : i32, i32
  }
  func.func @transform_2(%arg0: i32) -> (i32, i32) {
    %c0_i32 = arith.constant 0 : i32
    %c0_i32_0 = arith.constant 0 : i32
    %c0_i32_1 = arith.constant 0 : i32
    return %c0_i32, %c0_i32_0 : i32, i32
  }
  func.func @transform_3(%arg0: i32) -> (i32, i32, i32) {
    %c0_i32 = arith.constant 0 : i32
    %c0_i32_0 = arith.constant 0 : i32
    %c0_i32_1 = arith.constant 0 : i32
    return %arg0, %c0_i32, %c0_i32_0 : i32, i32, i32
  }
  func.func @transform_4(%arg0: i32) -> (i32, i32, i32) {
    %c0_i32 = arith.constant 0 : i32
    %c0_i32_0 = arith.constant 0 : i32
    %c0_i32_1 = arith.constant 0 : i32
    return %arg0, %c0_i32, %c0_i32_0 : i32, i32, i32
  }
}

module attributes {stable_mosaic.version = 11 : i64} {
  func.func @_bn_pool_gelu_kernel(%arg0: i32, %arg1: memref<1x8x16xf32, #tpu.memory_space<vmem>>, %arg2: memref<8x1xf32, #tpu.memory_space<vmem>>, %arg3: memref<8x1xf32, #tpu.memory_space<vmem>>, %arg4: memref<1x8x8xf32, #tpu.memory_space<vmem>>, %arg5: memref<16x8xf32, #tpu.memory_space<vmem>>) attributes {dimension_semantics = [#tpu.dimension_semantics<parallel>], iteration_bounds = array<i64: 2>, scalar_prefetch = 0 : i64, scratch_operands = 1 : i64, tpu.core_type = #tpu.core_type<tc>, window_params = [{transform_indices = @transform_0, window_bounds = array<i64: 1, 8, 16>}, {pipeline_mode = #tpu.pipeline_mode<synchronous>, transform_indices = @transform_1, window_bounds = array<i64: 8, 1>}, {pipeline_mode = #tpu.pipeline_mode<synchronous>, transform_indices = @transform_2, window_bounds = array<i64: 8, 1>}, {transform_indices = @transform_3, window_bounds = array<i64: 1, 8, 8>}]} {
    %c0 = arith.constant 0 : index
    %c0_0 = arith.constant 0 : index
    %c0_1 = arith.constant 0 : index
    %0 = vector.load %arg1[%c0, %c0_0, %c0_1] : memref<1x8x16xf32, #tpu.memory_space<vmem>>, vector<1x8x16xf32>
    %1 = vector.shape_cast %0 : vector<1x8x16xf32> to vector<8x16xf32>
    %c0_2 = arith.constant 0 : index
    %c0_3 = arith.constant 0 : index
    %2 = vector.load %arg2[%c0_2, %c0_3] : memref<8x1xf32, #tpu.memory_space<vmem>>, vector<8x1xf32>
    %3 = vector.broadcast %2 : vector<8x1xf32> to vector<8x16xf32>
    %4 = arith.mulf %1, %3 : vector<8x16xf32>
    %c0_4 = arith.constant 0 : index
    %c0_5 = arith.constant 0 : index
    %5 = vector.load %arg3[%c0_4, %c0_5] : memref<8x1xf32, #tpu.memory_space<vmem>>, vector<8x1xf32>
    %6 = vector.broadcast %5 : vector<8x1xf32> to vector<8x16xf32>
    %7 = arith.addf %4, %6 : vector<8x16xf32>
    %8 = tpu.transpose %7, [1, 0] : vector<8x16xf32> -> vector<16x8xf32>
    %c0_6 = arith.constant 0 : index
    %c0_7 = arith.constant 0 : index
    %9 = vector.load %arg5[%c0_6, %c0_7] : memref<16x8xf32, #tpu.memory_space<vmem>>, vector<16x8xf32>
    tpu.vector_store %arg5[%c0_6, %c0_7], %8 {strides = array<i32>} : memref<16x8xf32, #tpu.memory_space<vmem>>, vector<16x8xf32>,
    %c0_8 = arith.constant 0 : index
    %c0_9 = arith.constant 0 : index
    %10 = tpu.strided_load %arg5[%c0_8, %c0_9] {strides = array<i32: 2, 1>} : memref<16x8xf32, #tpu.memory_space<vmem>>, vector<8x8xf32>
    %c1 = arith.constant 1 : index
    %c0_10 = arith.constant 0 : index
    %11 = tpu.strided_load %arg5[%c1, %c0_10] {strides = array<i32: 2, 1>} : memref<16x8xf32, #tpu.memory_space<vmem>>, vector<8x8xf32>
    %12 = arith.maximumf %10, %11 : vector<8x8xf32>
    %13 = tpu.transpose %12, [1, 0] : vector<8x8xf32> -> vector<8x8xf32>
    %cst = arith.constant 5.000000e-01 : f32
    %14 = vector.broadcast %cst : f32 to vector<8x8xf32>
    %15 = arith.mulf %14, %13 : vector<8x8xf32>
    %cst_11 = arith.constant 0.707106769 : f32
    %16 = vector.broadcast %cst_11 : f32 to vector<8x8xf32>
    %17 = arith.mulf %13, %16 : vector<8x8xf32>
    %18 = math.erf %17 : vector<8x8xf32>
    %cst_12 = arith.constant 1.000000e+00 : f32
    %19 = vector.broadcast %cst_12 : f32 to vector<8x8xf32>
    %20 = arith.addf %19, %18 : vector<8x8xf32>
    %21 = arith.mulf %15, %20 : vector<8x8xf32>
    %c0_13 = arith.constant 0 : index
    %c0_14 = arith.constant 0 : index
    %c0_15 = arith.constant 0 : index
    %22 = vector.load %arg4[%c0_13, %c0_14, %c0_15] : memref<1x8x8xf32, #tpu.memory_space<vmem>>, vector<1x8x8xf32>
    %23 = vector.shape_cast %22 : vector<1x8x8xf32> to vector<8x8xf32>
    %24 = vector.shape_cast %21 : vector<8x8xf32> to vector<1x8x8xf32>
    tpu.vector_store %arg4[%c0_13, %c0_14, %c0_15], %24 {strides = array<i32>} : memref<1x8x8xf32, #tpu.memory_space<vmem>>, vector<1x8x8xf32>,
    return
  }
  func.func @transform_0(%arg0: i32) -> (i32, i32, i32) {
    %c0_i32 = arith.constant 0 : i32
    %c0_i32_0 = arith.constant 0 : i32
    %c0_i32_1 = arith.constant 0 : i32
    return %arg0, %c0_i32, %c0_i32_0 : i32, i32, i32
  }
  func.func @transform_1(%arg0: i32) -> (i32, i32) {
    %c0_i32 = arith.constant 0 : i32
    %c0_i32_0 = arith.constant 0 : i32
    %c0_i32_1 = arith.constant 0 : i32
    return %c0_i32, %c0_i32_0 : i32, i32
  }
  func.func @transform_2(%arg0: i32) -> (i32, i32) {
    %c0_i32 = arith.constant 0 : i32
    %c0_i32_0 = arith.constant 0 : i32
    %c0_i32_1 = arith.constant 0 : i32
    return %c0_i32, %c0_i32_0 : i32, i32
  }
  func.func @transform_3(%arg0: i32) -> (i32, i32, i32) {
    %c0_i32 = arith.constant 0 : i32
    %c0_i32_0 = arith.constant 0 : i32
    %c0_i32_1 = arith.constant 0 : i32
    return %arg0, %c0_i32, %c0_i32_0 : i32, i32, i32
  }
}

</mosaic_0001>

<bundles_post_ra>
// kernel: conv_layer_forward.3
= control target key start
LH: loop header
LB: loop body
LE: loop exit
PB: predicated region body
PF: predicated region fallthrough
CT: control target
= control target key end

     0   :  { %8 = vsyncpa [#allocation4], 0  ;;  %s565_s0 = inlined_call_operand.vmem [shape: f32[2,8,16], index: 0, kind: input, shape index: {}]   ;;  %s566_s1 = inlined_call_operand.vmem [shape: f32[8,1], index: 1, kind: input, shape index: {}]   ;;  %s567_s2 = inlined_call_operand.vmem [shape: f32[8,1], index: 2, kind: input, shape index: {}]   ;;  %s568_s3 = inlined_call_operand.hbm [shape: f32[2,8,8], index: 3, kind: output, shape index: {}]  }
   0x1   :  { %10 = vsyncpa [#allocation4 + $0x1], 0  ;;  %s469_s12 = smov 0   ;;  %s471_s13 = smov 0  }
   0x2   :  { %s473_s14 = smov 0   ;;  %s475_s15 = smov 0  }
   0x3 LB: > { %s490_s16 = sadd.s32 4294967295, %s445_s15   ;;  %s331_s17 = sadd.s32 4294967294, %s445_s15   ;;  %s445_s15 = sphi %s475_s15, %s574_s15   ;;  %s441_s14 = sphi %s473_s14, %s573_s14   ;;  %s437_s13 = sphi %s471_s13, %s572_s13   ;;  %s433_s12 = sphi %s469_s12, %s571_s12  }
   0x4   : > { %s494_s18 = sadd.s32 1, %s445_s15   ;;  %s91_s19 = sadd.s32 1, %s441_s14 }
   0x5   : > { %s88_s20 = ssub.s32 %s445_s15, %s494_s18  ;;  %p101_p0 = scmp.ne.s32.totalorder %s441_s14, %s437_s13 }
   0x6   : > { %p89_p1 = scmp.eq.s32.totalorder %s88_s20, 0  ;;  %p102_p2 = scmp.eq.s32.totalorder %s490_s16, 1 }
   0x7   : > { %p107_p3 = scmp.ne.s32.totalorder %s437_s13, %s433_s12  ;;  %p108_p4 = scmp.eq.s32.totalorder %s331_s17, 1 }
   0x8   : > { %s505_s21 = scalar_select %p89_p1, %s441_s14, %s91_s19  }
   0x9   : > { %p507_p5 = por %p102_p2, %p101_p0  ;;  %p511_p6 = por %p108_p4, %p107_p3 }
   0xa   : > { %p334_p7 = scmp.ge.s32.totalorder %s445_s15, 1  ;;  %p139_p8 = scmp.lt.s32.totalorder %s445_s15, 3 }
   0xc   : > { %p140_p9 = pnand %p334_p7, %p139_p8 }
   0xd   : > { %p162_p10 = scmp.lt.s32.totalorder (!%p140_p9), %s490_s16, 1  ;;  %s159_s6 = sand.u32 (!%p140_p9), 1, %s437_s13  }
   0xe   : > { %143 = sbr.rel (%p140_p9) target bundleno = 448 (0x1c0), region = 32  ;;  %s335_s7 = sshll.u32 (!%p140_p9), %s159_s6, 3 }
   0xf   : > { %s338_s8 = sshll.u32 (!%p140_p9), %s490_s16, 7  ;;  %s161_s9 = scalar_lea.vmem (!%p140_p9), [#allocation3], %s335_s7 }
  0x10   : > { %s272_s10 = sshll.u32 (!%p140_p9), %s161_s9, 4  ;;  %s270_s19 = scalar_lea.hbm (!%p140_p9), %s568_s3, %s338_s8  ;;  %s273_s10 = int_to_ptr.vmem [resolvable:$true] %s272_s10 }
  0x11   : > { %s259_s20 = scalar_lea.sflag (!%p140_p9), [#allocation4], %s159_s6  ;;  %s385_s24 = scalar_lea.vmem (!%p140_p9), %s273_s10, 128 }
  0x12   : > { %p386_p11 = scmp.ne.s32.totalorder (!%p140_p9), %s273_s10, %s385_s24  ;;  %s448_s25 = smov (!%p140_p9), [#allocation3]  }
  0x13   : > { %v167_v0 = vld [vmem:[%s566_s1] sm:$0xff]  ;;  %v447_v1 = vmov 0   ;;  %s163_s28 = scalar_select %p162_p10, %s490_s16, 1  ;;  %vm213_vm0 = vcmask 64512  }
  0x14   : > { %382 = vset.pattern.permute.xlu0 %v447_v1  ;;  %v174_v2 = vld [vmem:[%s567_s2] sm:$0xff]  ;;  %p387_p12 = pnand %p386_p11, %p507_p5  ;;  %s389_s16 = sshll.u32 %s448_s25, 4  ;;  %s390_s16 = int_to_ptr.vmem [resolvable:$false] %s389_s16 }
  0x15   : > { %170 = vperm.xlu0 %382, %v167_v0   ;;  %s336_s29 = sshll.u32 %s163_s28, 3  ;;  %s391_s26 = scalar_lea.vmem %s390_s16, 256 }
  0x16   : > { %s165_s5 = scalar_lea.vmem %s565_s0, %s336_s29  ;;  %p388_p13 = pneg %p387_p12 }
  0x17   : > { %v166_v4 = vld [vmem:[%s165_s5] sm:$0xff]  ;;  %p392_p0 = scmp.lt.s32.totalorder %s273_s10, %s390_s16  ;;  %p393_p1 = scmp.lt.s32.totalorder %s391_s26, %s385_s24 }
  0x19   : > { %177 = vperm.xlu0 %382, %v174_v2   ;;  %p394_p2 = por %p393_p1, %p392_p0 }
  0x1b   : > { %p395_p3 = pnand %p394_p2, %p388_p13 }
  0x90   : > { %v171_v3 = vpop.permute.xlu0 %170 }
  0x91   : > { %v173_v5 = vmul.f32 %v171_v3, %v166_v4 }
  0x94   : > { %v178_v6 = vpop.permute.xlu0 %177 }
  0x95   : > { %v180_v7 = vadd.f32 %v178_v6, %v173_v5 }
  0x97   : > { %181 = vxpose.xlu1.b32.start.end [1/1] (short) (narrow) %v180_v7, 16 }
 0x113   : > { %v197_v8 = vpop.trf.xlu1 }
 0x114   : > { %214 = vst.msk [vmem:[#allocation2] sm:$0xff] %vm213_vm0, %v197_v8 }
 0x117   : > { %v198_v9 = vpop.trf.xlu1 }
 0x118   : > { %215 = vst.msk [vmem:[#allocation2 + $0x8] sm:$0xff] %vm213_vm0, %v198_v9 }
 0x11f   : > { %v216_v10 = vld [vmem:[#allocation2] ss:$2 sm:$0xff]  ;;  %v218_v11 = vld [vmem:[#allocation2 + $0x1] ss:$2 sm:$0xff] }
 0x120   : > { %v219_v12 = vmax.f32 %v216_v10, %v218_v11 }
 0x122   : > { %220 = vxpose.xlu1.b32.start.end [1/1] (short) (narrow) %v219_v12, 8 }
 0x19e   : > { %v236_v13 = vpop.trf.xlu1 }
 0x19f   : > { %v253_v14 = vmul.f32 0.70710677, %v236_v13  ;;  %v252_v16 = vmul.f32 0.5, %v236_v13 }
 0x1a1   : > { %383 = verf.f32 %v253_v14 }
 0x1ae   : > { %v384_v15 = vpop.eup %383 }
 0x1af   : > { %v255_v17 = vadd.f32 1.0, %v384_v15 }
 0x1b1   : > { %v256_v18 = vmul.f32 %v255_v17, %v252_v16 }
 0x1b3   : > { %257 = vst.msk [vmem:[%s161_s9] sm:$0xff] %vm213_vm0, %v256_v18 }
 0x1b4   : > { %398 = shalt.err (!%p395_p3)
}
 0x1b5   : > { %s399_s27 = scalar_lea.hbm %s270_s19, 128  ;;  %s403_s30 = scalar_lea.hbm %s568_s3, 256 }
 0x1b6   : > { %p400_p4 = scmp.ne.s32.totalorder %s270_s19, %s399_s27  ;;  %p404_p9 = scmp.lt.s32.totalorder %s270_s19, %s568_s3 }
 0x1b7   : > { %p405_p10 = scmp.lt.s32.totalorder %s403_s30, %s399_s27 }
 0x1b8   : > { %p401_p7 = pnand %p400_p4, %p507_p5 }
 0x1b9   : > { %p406_p11 = por %p405_p10, %p404_p9 }
 0x1ba   : > { %p402_p8 = pneg %p401_p7 }
 0x1bc   : > { %p407_p12 = pnand %p406_p11, %p402_p8 }
 0x1be   : > { %410 = shalt.err (!%p407_p12)
}
 0x1bf   : > { %341 = dma.vmem_to_hbm [thread:$0]  (%p507_p5), %s273_s10, 128, %s270_s19, %s259_s20  }
 0x1c0 PF: > { %p347_p13 = scmp.ge.s32.totalorder %s445_s15, 2  ;;  %s284_s6 = sand.u32 1, %s433_s12  }
 0x1c1   : > { %s285_s7 = scalar_lea.sflag [#allocation4], %s284_s6 }
 0x1c2   : > { %p344_p0 = pnand %p347_p13, %p511_p6 }
 0x1c4   : > { %p345_p1 = pneg %p344_p0 }
 0x1c6   : > { %428 = dma.done.wait (%p345_p1), %s285_s7, 128  }
 0x1c7   : > { %430 = vsyncadd (%p345_p1), %s285_s7, 4294967168  ;;  %p13_p2 = scmp.ge.s32.totalorder %s494_s18, 4   ;;  %s571_s12 = smov %s437_s13 }
 0x1c8   : > { %s572_s13 = smov %s441_s14  ;;  %s573_s14 = smov %s505_s21 }
 0x1c9   : > { %s574_s15 = smov %s494_s18  ;;  %15 = sbr.rel (!%p13_p2) target bundleno = 3 (0x3), region = 68 }
 0x1ce   :  { %290 = vsyncpa [#allocation4], 1 }
 0x1cf   :  { %292 = vsyncpa [#allocation4 + $0x1], 1 }

// kernel: conv_layer_forward.2
= control target key start
LH: loop header
LB: loop body
LE: loop exit
PB: predicated region body
PF: predicated region fallthrough
CT: control target
= control target key end

     0   :  { %s451_s15 = smov 0   ;;  %s481_s0 = inlined_call_operand.vmem [shape: f32[2,4,16], index: 0, kind: input, shape index: {}]   ;;  %s482_s1 = inlined_call_operand.vmem [shape: f32[8,12], index: 1, kind: input, shape index: {}]   ;;  %s483_s2 = inlined_call_operand.vmem [shape: f32[8,1], index: 2, kind: input, shape index: {}]   ;;  %s484_s3 = inlined_call_operand.vmem [shape: f32[2,8,16], index: 3, kind: output, shape index: {0}]   ;;  %s485_s4 = inlined_call_operand.vmem [shape: f32[2,8,2], index: 4, kind: output, shape index: {1}]  }
   0x1 LB: > { %s379_s16 = sadd.s32 4294967295, %s419_s15   ;;  %p383_p0 = scmp.ge.s32.totalorder %s419_s15, 1  ;;  %s419_s15 = sphi %s451_s15, %s15_s15  }
   0x2   : > { %p164_p1 = scmp.lt.s32.totalorder %s419_s15, 3 }
   0x4   : > { %p165_p2 = pnand %p383_p0, %p164_p1 }
   0x5   : > { %p192_p3 = scmp.lt.s32.totalorder (!%p165_p2), %s379_s16, 1  ;;  %s422_s21 = smov (!%p165_p2), 127  }
   0x6   : > { %168 = sbr.rel (%p165_p2) target bundleno = 485 (0x1e5), region = 32  ;;  %s424_s22 = smov (!%p165_p2), 1  }
   0xb   : > { %vm206_vm0 = vcmask 3072   ;;  %v421_v0 = vmov 0.0   ;;  %s487_s16 = smov (!%p192_p3, %s379_s16), 1  ;;  %vm214_vm1 = vcmask 125952   ;;  %vm423_vm2 = vmmov 0   ;;  %v228_v2 = vld [vmem:[%s483_s2] sm:$0xff] }
   0xc   : > { %392 = vmatprep.subr.bf16.mxu0 %v421_v0  ;;  %207 = vst.msk [vmem:[#allocation2] sm:$0xf] %vm206_vm0, %v421_v0  ;;  %s384_s17 = sshll.u32 %s487_s16, 2  ;;  %394 = vmatprep.mubr.msk.bf16.mxu0 %vm423_vm2, %v421_v0  ;;  %v425_v3 = vmov 0   ;;  %vm219_vm3 = vcmask 117760   ;;  %vm221_vm4 = vcmask 126072  }
   0xd   : > { %s195_s20 = scalar_lea.vmem %s481_s0, %s384_s17  ;;  %411 = vset.pattern.permute.xlu1 %v425_v3  ;;  %412 = vset.pattern.permute.xlu0 %v425_v3  ;;  %vm212_vm5 = vcmask 125960   ;;  %vm238_vm6 = vcmask 1045504   ;;  %v223_v8 = vld [vmem:[%s482_s1] sm:$0xff]  ;;  %vm234_vm7 = vcmask 97280   ;;  %s385_s27 = sshll.u32 %s487_s16, 3  ;;  %vm282_vm8 = vcmask 130048  }
   0xe   : > { %v205_v1 = vld [vmem:[%s195_s20] sm:$0xf]  ;;  %231 = vperm.xlu1 %411, %v228_v2   ;;  %v224_v11 = vpack.c.bf16 %v223_v8, %v223_v8  ;;  %s199_s30 = scalar_lea.vmem %s484_s3, %s385_s27  ;;  %s203_s7 = scalar_lea.vmem %s485_s4, %s385_s27  ;;  %vm287_vm9 = vcmask 7168   ;;  %vm293_vm10 = vcmask 15368  }
   0xf   : > { %216 = vrot.lane.b32.xlu0 %v205_v1, %s422_s21  ;;  %215 = vst.msk [vmem:[#allocation2 + $0x4] sm:$0xf] %vm214_vm1, %v205_v1 }
  0x13   : > { %209 = vrot.lane.b32.xlu0 %v205_v1, %s424_s22 }
  0x81   : > { %v217_v4 = vpop.permute.xlu0 %216 }
  0x82   : > { %220 = vst.msk [vmem:[#allocation2 + $0x8] sm:$0xf] %vm219_vm3, %v217_v4 }
  0x83   : > { %222 = vst.msk [vmem:[#allocation2 + $0x8] sm:$0xf] %vm221_vm4, %v421_v0 }
  0x85   : > { %v210_v5 = vpop.permute.xlu0 %209 }
  0x86   : > { %213 = vst.msk [vmem:[#allocation2] sm:$0xf] %vm212_vm5, %v210_v5 }
  0x89   : > { %v232_v12 = vpop.permute.xlu1 %231 }
  0x8a   : > { %v226_v6 = vld [vmem:[#allocation2 + $0x8] sm:$0xf] }
  0x8d   : > { %v225_v7 = vld [vmem:[#allocation2] sm:$0xff] }
  0x8e   : > { %v227_v9 = vpack.c.bf16 %v226_v6, %v225_v7 }
  0x90   : > { %v240_v10 = vsel %vm238_vm6, %v227_v9, 0 }
  0x91   : > { %393 = vmatpush3.bf16.msra.mxu0 %v240_v10 }
  0x94   : > { %395 = vmatmul.mubr.msk.bf16.vlgmr.msra.gmra.mxu0 %vm234_vm7, %v224_v11 }
 0x154   : > { %v276_v13 = vpop.f32.mrf.mxu0 }
 0x155   : > { %v277_v14 = vadd.f32 %v276_v13, %v232_v12 }
 0x156   : > { %v396_v15 = vpop.f32.mrf.mxu0 }
 0x157   : > { %v284_v16 = vsel %vm282_vm8, %v277_v14, 0.0  ;;  %283 = vst.msk [vmem:[%s199_s30] sm:$0xff] %vm282_vm8, %v277_v14  ;;  %v289_v17 = vmul.f32 %v277_v14, %v277_v14 }
 0x158   : > { %285 = vadd.xlane.f32.xlu1 %v284_v16  ;;  %v279_v18 = vpop.f32.mrf.mxu0 }
 0x159   : > { %v290_v19 = vsel %vm282_vm8, %v289_v17, 0.0 }
 0x15a   : > { %291 = vadd.xlane.f32.xlu0 %v290_v19  ;;  %v397_v20 = vpop.f32.mrf.mxu0 }
 0x1e1   : > { %v286_v21 = vpop.xlane.xlu1 %285 }
 0x1e2   : > { %288 = vst.msk [vmem:[%s203_s7] sm:$0xff] %vm287_vm9, %v286_v21 }
 0x1e3   : > { %v292_v22 = vpop.xlane.xlu0 %291 }
 0x1e4   : > { %294 = vst.msk [vmem:[%s203_s7] sm:$0xff] %vm293_vm10, %v292_v22 }
 0x1e5 PF: > { %s15_s15 = sadd.s32 1, %s419_s15  }
 0x1e6   : > { %p12_p4 = scmp.ge.s32.totalorder %s15_s15, 4  }
 0x1e8   :  { %14 = sbr.rel (!%p12_p4) target bundleno = 1 (0x1), region = 74 }

</bundles_post_ra>
